<compile_context>
chip_gen: v5e
topology: v5e:2x2
jax: 0.10.0
libtpu: 0.0.40
codegen_flags: <defaults>
</compile_context>

<pallas_src>
import math
import jax
import jax.numpy as jnp
from jax.experimental import pallas as pl
from jax.experimental.pallas import tpu as pltpu


def _make_bi_cross_attention_kernel(num_heads, head_dim):
    """Fused QKV projection + cross attention for both directions; one batch
    element per grid step, all heads fused."""

    def kernel(ht_ref, hs_ref,
               wq_t_ref, bq_t_ref, wk_s_ref, bk_s_ref, wv_s_ref, bv_s_ref,
               wq_s_ref, bq_s_ref, wk_t_ref, bk_t_ref, wv_t_ref, bv_t_ref,
               mask_s_ref, mask_t_ref,
               out_t_ref, out_s_ref):
        cdt = ht_ref.dtype                 # MXU operand dtype follows inputs (bf16-friendly)
        ht = ht_ref[0]                     # [S_txt, C_txt]
        hs = hs_ref[0]                     # [S_smi, C_smi]

        def attend(h_q, h_kv, wq, bq, wk, bk, wv, bv, add_mask):
            # Full-width projections: [S, C] @ [C, H*d] (+ bias); f32 MXU accumulation.
            # 1/sqrt(d) is already folded into wq/bq at prepare_params() time.
            q = (jnp.dot(h_q, wq[...], preferred_element_type=jnp.float32)
                 + bq[...]).astype(cdt)
            k = (jnp.dot(h_kv, wk[...], preferred_element_type=jnp.float32)
                 + bk[...]).astype(cdt)
            v = (jnp.dot(h_kv, wv[...], preferred_element_type=jnp.float32)
                 + bv[...]).astype(cdt)

            ctx_heads = []
            for h in range(num_heads):     # static loop; per-head score / P@V matmuls
                sl = slice(h * head_dim, (h + 1) * head_dim)
                qh, kh, vh = q[:, sl], k[:, sl], v[:, sl]
                # scores = qh @ kh^T + mask   (f32, no explicit transpose copy)
                s = jax.lax.dot_general(qh, kh, (((1,), (1,)), ((), ())),
                                        preferred_element_type=jnp.float32)
                s = s + add_mask
                # Numerically stable softmax with DEFERRED normalization: keep the
                # un-normalized exp, run P@V, then scale the [S_q, d] result.
                m = jnp.max(s, axis=-1, keepdims=True)
                e = jnp.exp(s - m)
                denom = jnp.sum(e, axis=-1, keepdims=True)
                ctx = jnp.dot(e.astype(cdt), vh, preferred_element_type=jnp.float32)
                inv = pl.reciprocal(denom, approx=True)       # EUP slot (free-ish)
                inv = inv * (2.0 - denom * inv)               # 1 Newton step -> f32 accuracy
                ctx_heads.append(ctx * inv)
                # TODO(synk): attention-prob dropout is identity (inference); training
                # would draw a mask with pltpu.prng_random_bits inside the kernel.
            # Lane-dense [S, H*d] context, single unmasked store.
            return jnp.concatenate(ctx_heads, axis=-1)

        ctx_t = attend(ht, hs, wq_t_ref, bq_t_ref, wk_s_ref, bk_s_ref,
                       wv_s_ref, bv_s_ref, mask_s_ref[0])
        ctx_s = attend(hs, ht, wq_s_ref, bq_s_ref, wk_t_ref, bk_t_ref,
                       wv_t_ref, bv_t_ref, mask_t_ref[0])

        out_t_ref[0] = ctx_t.astype(out_t_ref.dtype)
        out_s_ref[0] = ctx_s.astype(out_s_ref.dtype)

    return kernel


def prepare_params(raw_params, num_heads):
    """One-time host-side parameter prep (hoisted out of the per-call path).

    PyTorch Linear weight [H*d, C] -> [C, H*d]; bias [H*d] -> [1, H*d].
    The attention scale 1/sqrt(d) is folded into the QUERY weights/biases here,
    in f32, BEFORE any later bf16 cast (see cast_prepared)."""
    all_head = raw_params["w_q_txt"].shape[0]
    head_dim = all_head // num_heads
    scale = 1.0 / math.sqrt(head_dim)

    prep = {"num_heads": num_heads, "head_dim": head_dim}
    for name in ("q_txt", "k_txt", "v_txt", "q_smi", "k_smi", "v_smi"):
        w = jnp.asarray(raw_params["w_" + name], jnp.float32)
        b = jnp.asarray(raw_params["b_" + name], jnp.float32)
        if name.startswith("q_"):
            w = w * scale
            b = b * scale
        prep["w_" + name] = jnp.transpose(w)                 # [C, H*d]
        prep["b_" + name] = b.reshape(1, all_head)           # [1, H*d]
    return prep


def cast_prepared(prep, dtype):
    """Cast floating parameter arrays (keeps ints like num_heads untouched)."""
    out = dict(prep)
    for k, v in prep.items():
        if hasattr(v, "dtype") and jnp.issubdtype(v.dtype, jnp.floating):
            out[k] = v.astype(dtype)
    return out


def _vmem_limit_bytes(S_t, C_t, S_s, C_s, A, dtype):
    """Rough VMEM residency estimate (double-buffered I/O + resident weights +
    f32 score working set), clamped to a range safe on v5e/v6e/v7x."""
    it = jnp.dtype(dtype).itemsize
    hidden = 2 * (S_t * C_t + S_s * C_s) * it                  # double-buffered hidden blocks
    weights = 2 * (3 * (C_t + C_s) * A + 6 * A) * it           # resident weights/biases (x2 bufs)
    masks = 2 * 2 * (S_t + S_s) * 4
    outs = 2 * (S_t + S_s) * A * it
    work = 4 * S_t * S_s * 4 + 4 * (S_t + S_s) * A * 4         # f32 scores/exp + q/k/v/ctx vregs
    est = 2 * (hidden + weights + masks + outs + work)
    return int(min(max(est, 32 * 1024 * 1024), 64 * 1024 * 1024))


def bert_bi_self_attention(h_txt, h_smi, prep, *, mask_txt=None, mask_smi=None):
    """Forward of BertBiSelfAttention (mode='normal', inference).

    h_txt: [B, S_txt, C_txt], h_smi: [B, S_smi, C_smi].
    Returns (context_txt [B,S_txt,H*d], context_smi [B,S_smi,H*d])."""
    # TODO(synk): mode='double-cross' (2nd pass feeding contexts back) not implemented.
    B, S_t, C_t = h_txt.shape
    Bs, S_s, C_s = h_smi.shape
    assert B == Bs
    H = prep["num_heads"]
    d = prep["head_dim"]
    A = H * d
    dtype = h_txt.dtype

    if mask_smi is None:
        mask_smi = jnp.zeros((B, S_s), jnp.float32)
    if mask_txt is None:
        mask_txt = jnp.zeros((B, S_t), jnp.float32)
    mask_smi = mask_smi.astype(jnp.float32).reshape(B, 1, S_s)
    mask_txt = mask_txt.astype(jnp.float32).reshape(B, 1, S_t)

    hid_spec_t = pl.BlockSpec((1, S_t, C_t), lambda b: (b, 0, 0))
    hid_spec_s = pl.BlockSpec((1, S_s, C_s), lambda b: (b, 0, 0))
    # Constant index_maps: weights/biases are DMA'd once and stay resident in VMEM.
    w_spec_t = pl.BlockSpec((C_t, A), lambda b: (0, 0))
    w_spec_s = pl.BlockSpec((C_s, A), lambda b: (0, 0))
    b_spec = pl.BlockSpec((1, A), lambda b: (0, 0))
    m_spec_s = pl.BlockSpec((1, 1, S_s), lambda b: (b, 0, 0))
    m_spec_t = pl.BlockSpec((1, 1, S_t), lambda b: (b, 0, 0))

    ctx_txt, ctx_smi = pl.pallas_call(
        _make_bi_cross_attention_kernel(H, d),
        out_shape=(jax.ShapeDtypeStruct((B, S_t, A), dtype),
                   jax.ShapeDtypeStruct((B, S_s, A), dtype)),
        grid_spec=pltpu.PrefetchScalarGridSpec(
            num_scalar_prefetch=0,
            grid=(B,),                    # keep B even for v7x's 2 TensorCores
            in_specs=[
                hid_spec_t, hid_spec_s,
                w_spec_t, b_spec,         # query_txt
                w_spec_s, b_spec,         # key_smi
                w_spec_s, b_spec,         # value_smi
                w_spec_s, b_spec,         # query_smi
                w_spec_t, b_spec,         # key_txt
                w_spec_t, b_spec,         # value_txt
                m_spec_s, m_spec_t,
            ],
            out_specs=[
                # Lane-dense direct [B, S, H*d] output blocks (no host transpose).
                pl.BlockSpec((1, S_t, A), lambda b: (b, 0, 0)),
                pl.BlockSpec((1, S_s, A), lambda b: (b, 0, 0)),
            ],
        ),
        compiler_params=pltpu.CompilerParams(
            dimension_semantics=("parallel",),
            vmem_limit_bytes=_vmem_limit_bytes(S_t, C_t, S_s, C_s, A, dtype)),
    )(h_txt, h_smi,
      prep["w_q_txt"], prep["b_q_txt"], prep["w_k_smi"], prep["b_k_smi"],
      prep["w_v_smi"], prep["b_v_smi"], prep["w_q_smi"], prep["b_q_smi"],
      prep["w_k_txt"], prep["b_k_txt"], prep["w_v_txt"], prep["b_v_txt"],
      mask_smi, mask_txt)

    return ctx_txt, ctx_smi


def reference(h_txt, h_smi, raw, num_heads, mask_txt=None, mask_smi=None):
    """Pure-JAX reference mirroring the PyTorch forward (mode='normal', eval)."""
    f32 = jnp.float32
    hi = jax.lax.Precision.HIGHEST

    def proj(x, w, b):
        return jnp.dot(x.astype(f32), w.T.astype(f32), precision=hi) + b.astype(f32)

    def heads(x):
        B, S, A = x.shape
        dd = A // num_heads
        return x.reshape(B, S, num_heads, dd).transpose(0, 2, 1, 3)

    def cross(h1, h2, wq, bq, wk, bk, wv, bv, mask2):
        q = heads(proj(h1, wq, bq))
        k = heads(proj(h2, wk, bk))
        v = heads(proj(h2, wv, bv))
        dd = q.shape[-1]
        s = jnp.einsum("bhqd,bhkd->bhqk", q, k, precision=hi) / math.sqrt(dd)
        if mask2 is not None:
            s = s + mask2[:, None, None, :].astype(f32)
        p = jax.nn.softmax(s, axis=-1)
        c = jnp.einsum("bhqk,bhkd->bhqd", p, v, precision=hi)
        B, H, S1, _ = c.shape
        return c.transpose(0, 2, 1, 3).reshape(B, S1, H * dd)

    ctx_t = cross(h_txt, h_smi, raw["w_q_txt"], raw["b_q_txt"], raw["w_k_smi"],
                  raw["b_k_smi"], raw["w_v_smi"], raw["b_v_smi"], mask_smi)
    ctx_s = cross(h_smi, h_txt, raw["w_q_smi"], raw["b_q_smi"], raw["w_k_txt"],
                  raw["b_k_txt"], raw["w_v_txt"], raw["b_v_txt"], mask_txt)
    return ctx_t, ctx_s


if __name__ == "__main__":
    # Small config: batch=2, seq_txt=8, seq_smi=16, txt_hidden=48, smi_hidden=32,
    # bi_hidden=32, heads=2 (head_dim=16). Grid = (2,) -> even, megacore-friendly.
    # NOTE: tile-quality conclusions must be re-validated at production shapes
    # (S=128-512, C=768, d=64, H=12) — demo shapes are below one vreg tile.
    B = 2
    S_txt, S_smi = 8, 16
    txt_hidden, smi_hidden = 48, 32
    bi_hidden, num_heads = 32, 2

    key = jax.random.PRNGKey(0)
    keys = jax.random.split(key, 16)
    h_txt = jax.random.normal(keys[0], (B, S_txt, txt_hidden), dtype=jnp.float32)
    h_smi = jax.random.normal(keys[1], (B, S_smi, smi_hidden), dtype=jnp.float32)

    def linear_init(kw, kb, out_f, in_f):
        bound = 1.0 / math.sqrt(in_f)
        w = jax.random.uniform(kw, (out_f, in_f), minval=-bound, maxval=bound,
                               dtype=jnp.float32)
        b = jax.random.uniform(kb, (out_f,), minval=-bound, maxval=bound,
                               dtype=jnp.float32)
        return w, b

    raw = {}
    raw["w_q_txt"], raw["b_q_txt"] = linear_init(keys[2], keys[3], bi_hidden, txt_hidden)
    raw["w_k_txt"], raw["b_k_txt"] = linear_init(keys[4], keys[5], bi_hidden, txt_hidden)
    raw["w_v_txt"], raw["b_v_txt"] = linear_init(keys[6], keys[7], bi_hidden, txt_hidden)
    raw["w_q_smi"], raw["b_q_smi"] = linear_init(keys[8], keys[9], bi_hidden, smi_hidden)
    raw["w_k_smi"], raw["b_k_smi"] = linear_init(keys[10], keys[11], bi_hidden, smi_hidden)
    raw["w_v_smi"], raw["b_v_smi"] = linear_init(keys[12], keys[13], bi_hidden, smi_hidden)

    # BERT-style additive key masks (0 = attend, -10000 = padding)
    smi_valid = jnp.array([S_smi, 10])
    txt_valid = jnp.array([S_txt, 5])
    mask_smi = jnp.where(jnp.arange(S_smi)[None, :] < smi_valid[:, None], 0.0, -10000.0)
    mask_txt = jnp.where(jnp.arange(S_txt)[None, :] < txt_valid[:, None], 0.0, -10000.0)

    prep = prepare_params(raw, num_heads)   # one-time weight re-layout + scale fold (f32)

    # f32 run + correctness check (approx-reciprocal + 1 Newton step keeps f32-grade accuracy)
    ctx_txt, ctx_smi = bert_bi_self_attention(h_txt, h_smi, prep,
                                              mask_txt=mask_txt, mask_smi=mask_smi)
    ctx_txt, ctx_smi = jax.block_until_ready((ctx_txt, ctx_smi))

    ref_txt, ref_smi = reference(h_txt, h_smi, raw, num_heads,
                                 mask_txt=mask_txt, mask_smi=mask_smi)
    assert ctx_txt.shape == (B, S_txt, bi_hidden)
    assert ctx_smi.shape == (B, S_smi, bi_hidden)
    assert jnp.allclose(ctx_txt, ref_txt, atol=1e-3, rtol=1e-3), \
        f"txt max abs err {jnp.max(jnp.abs(ctx_txt - ref_txt))}"
    assert jnp.allclose(ctx_smi, ref_smi, atol=1e-3, rtol=1e-3), \
        f"smi max abs err {jnp.max(jnp.abs(ctx_smi - ref_smi))}"

    # bf16 run (production dtype). NOTE: q/k/v and the un-normalized exp are cast
    # to bf16 before the MXU matmuls (f32 accumulation) — intentional inference
    # precision trade-off, covered by the looser tolerance below.
    prep_bf16 = cast_prepared(prep, jnp.bfloat16)
    ctx_txt_bf, ctx_smi_bf = bert_bi_self_attention(
        h_txt.astype(jnp.bfloat16), h_smi.astype(jnp.bfloat16), prep_bf16,
        mask_txt=mask_txt, mask_smi=mask_smi)
    ctx_txt_bf, ctx_smi_bf = jax.block_until_ready((ctx_txt_bf, ctx_smi_bf))
    assert jnp.allclose(ctx_txt_bf.astype(jnp.float32), ref_txt, atol=5e-2, rtol=5e-2)
    assert jnp.allclose(ctx_smi_bf.astype(jnp.float32), ref_smi, atol=5e-2, rtol=5e-2)

    print("KERNEL_OK")
</pallas_src>

<mosaic_0001>
module attributes {stable_mosaic.version = 11 : i64} {
  func.func @kernel(%arg0: i32, %arg1: memref<1x8x48xf32, #tpu.memory_space<vmem>>, %arg2: memref<1x16x32xf32, #tpu.memory_space<vmem>>, %arg3: memref<48x32xf32, #tpu.memory_space<vmem>>, %arg4: memref<1x32xf32, #tpu.memory_space<vmem>>, %arg5: memref<32x32xf32, #tpu.memory_space<vmem>>, %arg6: memref<1x32xf32, #tpu.memory_space<vmem>>, %arg7: memref<32x32xf32, #tpu.memory_space<vmem>>, %arg8: memref<1x32xf32, #tpu.memory_space<vmem>>, %arg9: memref<32x32xf32, #tpu.memory_space<vmem>>, %arg10: memref<1x32xf32, #tpu.memory_space<vmem>>, %arg11: memref<48x32xf32, #tpu.memory_space<vmem>>, %arg12: memref<1x32xf32, #tpu.memory_space<vmem>>, %arg13: memref<48x32xf32, #tpu.memory_space<vmem>>, %arg14: memref<1x32xf32, #tpu.memory_space<vmem>>, %arg15: memref<1x1x16xf32, #tpu.memory_space<vmem>>, %arg16: memref<1x1x8xf32, #tpu.memory_space<vmem>>, %arg17: memref<1x8x32xf32, #tpu.memory_space<vmem>>, %arg18: memref<1x16x32xf32, #tpu.memory_space<vmem>>) attributes {dimension_semantics = [#tpu.dimension_semantics<parallel>], iteration_bounds = array<i64: 2>, scalar_prefetch = 0 : i64, scratch_operands = 0 : i64, tpu.core_type = #tpu.core_type<tc>, window_params = [{transform_indices = @transform_0, window_bounds = array<i64: 1, 8, 48>}, {transform_indices = @transform_1, window_bounds = array<i64: 1, 16, 32>}, {pipeline_mode = #tpu.pipeline_mode<synchronous>, transform_indices = @transform_2, window_bounds = array<i64: 48, 32>}, {pipeline_mode = #tpu.pipeline_mode<synchronous>, transform_indices = @transform_3, window_bounds = array<i64: 1, 32>}, {pipeline_mode = #tpu.pipeline_mode<synchronous>, transform_indices = @transform_4, window_bounds = array<i64: 32, 32>}, {pipeline_mode = #tpu.pipeline_mode<synchronous>, transform_indices = @transform_5, window_bounds = array<i64: 1, 32>}, {pipeline_mode = #tpu.pipeline_mode<synchronous>, transform_indices = @transform_6, window_bounds = array<i64: 32, 32>}, {pipeline_mode = #tpu.pipeline_mode<synchronous>, transform_indices = @transform_7, window_bounds = array<i64: 1, 32>}, {pipeline_mode = #tpu.pipeline_mode<synchronous>, transform_indices = @transform_8, window_bounds = array<i64: 32, 32>}, {pipeline_mode = #tpu.pipeline_mode<synchronous>, transform_indices = @transform_9, window_bounds = array<i64: 1, 32>}, {pipeline_mode = #tpu.pipeline_mode<synchronous>, transform_indices = @transform_10, window_bounds = array<i64: 48, 32>}, {pipeline_mode = #tpu.pipeline_mode<synchronous>, transform_indices = @transform_11, window_bounds = array<i64: 1, 32>}, {pipeline_mode = #tpu.pipeline_mode<synchronous>, transform_indices = @transform_12, window_bounds = array<i64: 48, 32>}, {pipeline_mode = #tpu.pipeline_mode<synchronous>, transform_indices = @transform_13, window_bounds = array<i64: 1, 32>}, {transform_indices = @transform_14, window_bounds = array<i64: 1, 1, 16>}, {transform_indices = @transform_15, window_bounds = array<i64: 1, 1, 8>}, {transform_indices = @transform_16, window_bounds = array<i64: 1, 8, 32>}, {transform_indices = @transform_17, window_bounds = array<i64: 1, 16, 32>}]} {
    %c0 = arith.constant 0 : index
    %c0_0 = arith.constant 0 : index
    %c0_1 = arith.constant 0 : index
    %0 = vector.load %arg1[%c0, %c0_0, %c0_1] : memref<1x8x48xf32, #tpu.memory_space<vmem>>, vector<1x8x48xf32>
    %1 = vector.shape_cast %0 : vector<1x8x48xf32> to vector<8x48xf32>
    %c0_2 = arith.constant 0 : index
    %c0_3 = arith.constant 0 : index
    %c0_4 = arith.constant 0 : index
    %2 = vector.load %arg2[%c0_2, %c0_3, %c0_4] : memref<1x16x32xf32, #tpu.memory_space<vmem>>, vector<1x16x32xf32>
    %3 = vector.shape_cast %2 : vector<1x16x32xf32> to vector<16x32xf32>
    %c0_5 = arith.constant 0 : index
    %c0_6 = arith.constant 0 : index
    %c0_7 = arith.constant 0 : index
    %4 = vector.load %arg15[%c0_5, %c0_6, %c0_7] : memref<1x1x16xf32, #tpu.memory_space<vmem>>, vector<1x1x16xf32>
    %5 = vector.shape_cast %4 : vector<1x1x16xf32> to vector<1x16xf32>
    %c0_8 = arith.constant 0 : index
    %c0_9 = arith.constant 0 : index
    %6 = vector.load %arg3[%c0_8, %c0_9] : memref<48x32xf32, #tpu.memory_space<vmem>>, vector<48x32xf32>
    %cst = arith.constant dense<0.000000e+00> : vector<8x32xf32>
    %7 = tpu.matmul %1, %6, %cst {dimension_numbers = #tpu.dot_dimension_numbers<[1], [0], [0], [1], [0, 0, 1, 1], [], []>} : vector<8x48xf32>, vector<48x32xf32>, vector<8x32xf32> -> vector<8x32xf32>
    %c0_10 = arith.constant 0 : index
    %c0_11 = arith.constant 0 : index
    %8 = vector.load %arg4[%c0_10, %c0_11] : memref<1x32xf32, #tpu.memory_space<vmem>>, vector<1x32xf32>
    %9 = vector.broadcast %8 : vector<1x32xf32> to vector<8x32xf32>
    %10 = arith.addf %7, %9 : vector<8x32xf32>
    %c0_12 = arith.constant 0 : index
    %c0_13 = arith.constant 0 : index
    %11 = vector.load %arg5[%c0_12, %c0_13] : memref<32x32xf32, #tpu.memory_space<vmem>>, vector<32x32xf32>
    %cst_14 = arith.constant dense<0.000000e+00> : vector<16x32xf32>
    %12 = tpu.matmul %3, %11, %cst_14 {dimension_numbers = #tpu.dot_dimension_numbers<[1], [0], [0], [1], [0, 0, 1, 1], [], []>} : vector<16x32xf32>, vector<32x32xf32>, vector<16x32xf32> -> vector<16x32xf32>
    %c0_15 = arith.constant 0 : index
    %c0_16 = arith.constant 0 : index
    %13 = vector.load %arg6[%c0_15, %c0_16] : memref<1x32xf32, #tpu.memory_space<vmem>>, vector<1x32xf32>
    %14 = vector.broadcast %13 : vector<1x32xf32> to vector<16x32xf32>
    %15 = arith.addf %12, %14 : vector<16x32xf32>
    %c0_17 = arith.constant 0 : index
    %c0_18 = arith.constant 0 : index
    %16 = vector.load %arg7[%c0_17, %c0_18] : memref<32x32xf32, #tpu.memory_space<vmem>>, vector<32x32xf32>
    %cst_19 = arith.constant dense<0.000000e+00> : vector<16x32xf32>
    %17 = tpu.matmul %3, %16, %cst_19 {dimension_numbers = #tpu.dot_dimension_numbers<[1], [0], [0], [1], [0, 0, 1, 1], [], []>} : vector<16x32xf32>, vector<32x32xf32>, vector<16x32xf32> -> vector<16x32xf32>
    %c0_20 = arith.constant 0 : index
    %c0_21 = arith.constant 0 : index
    %18 = vector.load %arg8[%c0_20, %c0_21] : memref<1x32xf32, #tpu.memory_space<vmem>>, vector<1x32xf32>
    %19 = vector.broadcast %18 : vector<1x32xf32> to vector<16x32xf32>
    %20 = arith.addf %17, %19 : vector<16x32xf32>
    %21 = vector.extract_strided_slice %10 {offsets = [0, 0], sizes = [8, 16], strides = [1, 1]} : vector<8x32xf32> to vector<8x16xf32>
    %22 = vector.extract_strided_slice %15 {offsets = [0, 0], sizes = [16, 16], strides = [1, 1]} : vector<16x32xf32> to vector<16x16xf32>
    %23 = vector.extract_strided_slice %20 {offsets = [0, 0], sizes = [16, 16], strides = [1, 1]} : vector<16x32xf32> to vector<16x16xf32>
    %cst_22 = arith.constant dense<0.000000e+00> : vector<8x16xf32>
    %24 = tpu.matmul %21, %22, %cst_22 {dimension_numbers = #tpu.dot_dimension_numbers<[1], [1], [0], [0], [0, 0, 1, 0], [], []>} : vector<8x16xf32>, vector<16x16xf32>, vector<8x16xf32> -> vector<8x16xf32>
    %25 = vector.broadcast %5 : vector<1x16xf32> to vector<8x16xf32>
    %26 = arith.addf %24, %25 : vector<8x16xf32>
    %cst_23 = arith.constant dense<0xFF800000> : vector<8xf32>
    %27 = vector.multi_reduction <maximumf>, %26, %cst_23 [1] : vector<8x16xf32> to vector<8xf32>
    %28 = vector.shape_cast %27 : vector<8xf32> to vector<8x1xf32>
    %29 = vector.broadcast %28 : vector<8x1xf32> to vector<8x16xf32>
    %30 = arith.subf %26, %29 : vector<8x16xf32>
    %31 = math.exp %30 : vector<8x16xf32>
    %cst_24 = arith.constant dense<0.000000e+00> : vector<8xf32>
    %32 = vector.multi_reduction <add>, %31, %cst_24 [1] : vector<8x16xf32> to vector<8xf32>
    %33 = vector.shape_cast %32 : vector<8xf32> to vector<8x1xf32>
    %cst_25 = arith.constant dense<0.000000e+00> : vector<8x16xf32>
    %34 = tpu.matmul %31, %23, %cst_25 {dimension_numbers = #tpu.dot_dimension_numbers<[1], [0], [0], [1], [0, 0, 1, 1], [], []>} : vector<8x16xf32>, vector<16x16xf32>, vector<8x16xf32> -> vector<8x16xf32>
    %35 = tpu.reciprocal %33 {approx = true} : vector<8x1xf32> -> vector<8x1xf32>
    %36 = arith.mulf %33, %35 : vector<8x1xf32>
    %cst_26 = arith.constant 2.000000e+00 : f32
    %37 = vector.broadcast %cst_26 : f32 to vector<8x1xf32>
    %38 = arith.subf %37, %36 : vector<8x1xf32>
    %39 = arith.mulf %35, %38 : vector<8x1xf32>
    %40 = vector.broadcast %39 : vector<8x1xf32> to vector<8x16xf32>
    %41 = arith.mulf %34, %40 : vector<8x16xf32>
    %42 = vector.extract_strided_slice %10 {offsets = [0, 16], sizes = [8, 16], strides = [1, 1]} : vector<8x32xf32> to vector<8x16xf32>
    %43 = vector.extract_strided_slice %15 {offsets = [0, 16], sizes = [16, 16], strides = [1, 1]} : vector<16x32xf32> to vector<16x16xf32>
    %44 = vector.extract_strided_slice %20 {offsets = [0, 16], sizes = [16, 16], strides = [1, 1]} : vector<16x32xf32> to vector<16x16xf32>
    %cst_27 = arith.constant dense<0.000000e+00> : vector<8x16xf32>
    %45 = tpu.matmul %42, %43, %cst_27 {dimension_numbers = #tpu.dot_dimension_numbers<[1], [1], [0], [0], [0, 0, 1, 0], [], []>} : vector<8x16xf32>, vector<16x16xf32>, vector<8x16xf32> -> vector<8x16xf32>
    %46 = vector.broadcast %5 : vector<1x16xf32> to vector<8x16xf32>
    %47 = arith.addf %45, %46 : vector<8x16xf32>
    %cst_28 = arith.constant dense<0xFF800000> : vector<8xf32>
    %48 = vector.multi_reduction <maximumf>, %47, %cst_28 [1] : vector<8x16xf32> to vector<8xf32>
    %49 = vector.shape_cast %48 : vector<8xf32> to vector<8x1xf32>
    %50 = vector.broadcast %49 : vector<8x1xf32> to vector<8x16xf32>
    %51 = arith.subf %47, %50 : vector<8x16xf32>
    %52 = math.exp %51 : vector<8x16xf32>
    %cst_29 = arith.constant dense<0.000000e+00> : vector<8xf32>
    %53 = vector.multi_reduction <add>, %52, %cst_29 [1] : vector<8x16xf32> to vector<8xf32>
    %54 = vector.shape_cast %53 : vector<8xf32> to vector<8x1xf32>
    %cst_30 = arith.constant dense<0.000000e+00> : vector<8x16xf32>
    %55 = tpu.matmul %52, %44, %cst_30 {dimension_numbers = #tpu.dot_dimension_numbers<[1], [0], [0], [1], [0, 0, 1, 1], [], []>} : vector<8x16xf32>, vector<16x16xf32>, vector<8x16xf32> -> vector<8x16xf32>
    %56 = tpu.reciprocal %54 {approx = true} : vector<8x1xf32> -> vector<8x1xf32>
    %57 = arith.mulf %54, %56 : vector<8x1xf32>
    %cst_31 = arith.constant 2.000000e+00 : f32
    %58 = vector.broadcast %cst_31 : f32 to vector<8x1xf32>
    %59 = arith.subf %58, %57 : vector<8x1xf32>
    %60 = arith.mulf %56, %59 : vector<8x1xf32>
    %61 = vector.broadcast %60 : vector<8x1xf32> to vector<8x16xf32>
    %62 = arith.mulf %55, %61 : vector<8x16xf32>
    %63 = tpu.concatenate %41, %62 in 1 : vector<8x16xf32>, vector<8x16xf32> -> vector<8x32xf32>
    %c0_32 = arith.constant 0 : index
    %c0_33 = arith.constant 0 : index
    %c0_34 = arith.constant 0 : index
    %64 = vector.load %arg16[%c0_32, %c0_33, %c0_34] : memref<1x1x8xf32, #tpu.memory_space<vmem>>, vector<1x1x8xf32>
    %65 = vector.shape_cast %64 : vector<1x1x8xf32> to vector<1x8xf32>
    %c0_35 = arith.constant 0 : index
    %c0_36 = arith.constant 0 : index
    %66 = vector.load %arg9[%c0_35, %c0_36] : memref<32x32xf32, #tpu.memory_space<vmem>>, vector<32x32xf32>
    %cst_37 = arith.constant dense<0.000000e+00> : vector<16x32xf32>
    %67 = tpu.matmul %3, %66, %cst_37 {dimension_numbers = #tpu.dot_dimension_numbers<[1], [0], [0], [1], [0, 0, 1, 1], [], []>} : vector<16x32xf32>, vector<32x32xf32>, vector<16x32xf32> -> vector<16x32xf32>
    %c0_38 = arith.constant 0 : index
    %c0_39 = arith.constant 0 : index
    %68 = vector.load %arg10[%c0_38, %c0_39] : memref<1x32xf32, #tpu.memory_space<vmem>>, vector<1x32xf32>
    %69 = vector.broadcast %68 : vector<1x32xf32> to vector<16x32xf32>
    %70 = arith.addf %67, %69 : vector<16x32xf32>
    %c0_40 = arith.constant 0 : index
    %c0_41 = arith.constant 0 : index
    %71 = vector.load %arg11[%c0_40, %c0_41] : memref<48x32xf32, #tpu.memory_space<vmem>>, vector<48x32xf32>
    %cst_42 = arith.constant dense<0.000000e+00> : vector<8x32xf32>
    %72 = tpu.matmul %1, %71, %cst_42 {dimension_numbers = #tpu.dot_dimension_numbers<[1], [0], [0], [1], [0, 0, 1, 1], [], []>} : vector<8x48xf32>, vector<48x32xf32>, vector<8x32xf32> -> vector<8x32xf32>
    %c0_43 = arith.constant 0 : index
    %c0_44 = arith.constant 0 : index
    %73 = vector.load %arg12[%c0_43, %c0_44] : memref<1x32xf32, #tpu.memory_space<vmem>>, vector<1x32xf32>
    %74 = vector.broadcast %73 : vector<1x32xf32> to vector<8x32xf32>
    %75 = arith.addf %72, %74 : vector<8x32xf32>
    %c0_45 = arith.constant 0 : index
    %c0_46 = arith.constant 0 : index
    %76 = vector.load %arg13[%c0_45, %c0_46] : memref<48x32xf32, #tpu.memory_space<vmem>>, vector<48x32xf32>
    %cst_47 = arith.constant dense<0.000000e+00> : vector<8x32xf32>
    %77 = tpu.matmul %1, %76, %cst_47 {dimension_numbers = #tpu.dot_dimension_numbers<[1], [0], [0], [1], [0, 0, 1, 1], [], []>} : vector<8x48xf32>, vector<48x32xf32>, vector<8x32xf32> -> vector<8x32xf32>
    %c0_48 = arith.constant 0 : index
    %c0_49 = arith.constant 0 : index
    %78 = vector.load %arg14[%c0_48, %c0_49] : memref<1x32xf32, #tpu.memory_space<vmem>>, vector<1x32xf32>
    %79 = vector.broadcast %78 : vector<1x32xf32> to vector<8x32xf32>
    %80 = arith.addf %77, %79 : vector<8x32xf32>
    %81 = vector.extract_strided_slice %70 {offsets = [0, 0], sizes = [16, 16], strides = [1, 1]} : vector<16x32xf32> to vector<16x16xf32>
    %82 = vector.extract_strided_slice %75 {offsets = [0, 0], sizes = [8, 16], strides = [1, 1]} : vector<8x32xf32> to vector<8x16xf32>
    %83 = vector.extract_strided_slice %80 {offsets = [0, 0], sizes = [8, 16], strides = [1, 1]} : vector<8x32xf32> to vector<8x16xf32>
    %cst_50 = arith.constant dense<0.000000e+00> : vector<16x8xf32>
    %84 = tpu.matmul %81, %82, %cst_50 {dimension_numbers = #tpu.dot_dimension_numbers<[1], [1], [0], [0], [0, 0, 1, 0], [], []>} : vector<16x16xf32>, vector<8x16xf32>, vector<16x8xf32> -> vector<16x8xf32>
    %85 = vector.broadcast %65 : vector<1x8xf32> to vector<16x8xf32>
    %86 = arith.addf %84, %85 : vector<16x8xf32>
    %cst_51 = arith.constant dense<0xFF800000> : vector<16xf32>
    %87 = vector.multi_reduction <maximumf>, %86, %cst_51 [1] : vector<16x8xf32> to vector<16xf32>
    %88 = vector.shape_cast %87 : vector<16xf32> to vector<16x1xf32>
    %89 = vector.broadcast %88 : vector<16x1xf32> to vector<16x8xf32>
    %90 = arith.subf %86, %89 : vector<16x8xf32>
    %91 = math.exp %90 : vector<16x8xf32>
    %cst_52 = arith.constant dense<0.000000e+00> : vector<16xf32>
    %92 = vector.multi_reduction <add>, %91, %cst_52 [1] : vector<16x8xf32> to vector<16xf32>
    %93 = vector.shape_cast %92 : vector<16xf32> to vector<16x1xf32>
    %cst_53 = arith.constant dense<0.000000e+00> : vector<16x16xf32>
    %94 = tpu.matmul %91, %83, %cst_53 {dimension_numbers = #tpu.dot_dimension_numbers<[1], [0], [0], [1], [0, 0, 1, 1], [], []>} : vector<16x8xf32>, vector<8x16xf32>, vector<16x16xf32> -> vector<16x16xf32>
    %95 = tpu.reciprocal %93 {approx = true} : vector<16x1xf32> -> vector<16x1xf32>
    %96 = arith.mulf %93, %95 : vector<16x1xf32>
    %cst_54 = arith.constant 2.000000e+00 : f32
    %97 = vector.broadcast %cst_54 : f32 to vector<16x1xf32>
    %98 = arith.subf %97, %96 : vector<16x1xf32>
    %99 = arith.mulf %95, %98 : vector<16x1xf32>
    %100 = vector.broadcast %99 : vector<16x1xf32> to vector<16x16xf32>
    %101 = arith.mulf %94, %100 : vector<16x16xf32>
    %102 = vector.extract_strided_slice %70 {offsets = [0, 16], sizes = [16, 16], strides = [1, 1]} : vector<16x32xf32> to vector<16x16xf32>
    %103 = vector.extract_strided_slice %75 {offsets = [0, 16], sizes = [8, 16], strides = [1, 1]} : vector<8x32xf32> to vector<8x16xf32>
    %104 = vector.extract_strided_slice %80 {offsets = [0, 16], sizes = [8, 16], strides = [1, 1]} : vector<8x32xf32> to vector<8x16xf32>
    %cst_55 = arith.constant dense<0.000000e+00> : vector<16x8xf32>
    %105 = tpu.matmul %102, %103, %cst_55 {dimension_numbers = #tpu.dot_dimension_numbers<[1], [1], [0], [0], [0, 0, 1, 0], [], []>} : vector<16x16xf32>, vector<8x16xf32>, vector<16x8xf32> -> vector<16x8xf32>
    %106 = vector.broadcast %65 : vector<1x8xf32> to vector<16x8xf32>
    %107 = arith.addf %105, %106 : vector<16x8xf32>
    %cst_56 = arith.constant dense<0xFF800000> : vector<16xf32>
    %108 = vector.multi_reduction <maximumf>, %107, %cst_56 [1] : vector<16x8xf32> to vector<16xf32>
    %109 = vector.shape_cast %108 : vector<16xf32> to vector<16x1xf32>
    %110 = vector.broadcast %109 : vector<16x1xf32> to vector<16x8xf32>
    %111 = arith.subf %107, %110 : vector<16x8xf32>
    %112 = math.exp %111 : vector<16x8xf32>
    %cst_57 = arith.constant dense<0.000000e+00> : vector<16xf32>
    %113 = vector.multi_reduction <add>, %112, %cst_57 [1] : vector<16x8xf32> to vector<16xf32>
    %114 = vector.shape_cast %113 : vector<16xf32> to vector<16x1xf32>
    %cst_58 = arith.constant dense<0.000000e+00> : vector<16x16xf32>
    %115 = tpu.matmul %112, %104, %cst_58 {dimension_numbers = #tpu.dot_dimension_numbers<[1], [0], [0], [1], [0, 0, 1, 1], [], []>} : vector<16x8xf32>, vector<8x16xf32>, vector<16x16xf32> -> vector<16x16xf32>
    %116 = tpu.reciprocal %114 {approx = true} : vector<16x1xf32> -> vector<16x1xf32>
    %117 = arith.mulf %114, %116 : vector<16x1xf32>
    %cst_59 = arith.constant 2.000000e+00 : f32
    %118 = vector.broadcast %cst_59 : f32 to vector<16x1xf32>
    %119 = arith.subf %118, %117 : vector<16x1xf32>
    %120 = arith.mulf %116, %119 : vector<16x1xf32>
    %121 = vector.broadcast %120 : vector<16x1xf32> to vector<16x16xf32>
    %122 = arith.mulf %115, %121 : vector<16x16xf32>
    %123 = tpu.concatenate %101, %122 in 1 : vector<16x16xf32>, vector<16x16xf32> -> vector<16x32xf32>
    %c0_60 = arith.constant 0 : index
    %c0_61 = arith.constant 0 : index
    %c0_62 = arith.constant 0 : index
    %124 = vector.load %arg17[%c0_60, %c0_61, %c0_62] : memref<1x8x32xf32, #tpu.memory_space<vmem>>, vector<1x8x32xf32>
    %125 = vector.shape_cast %124 : vector<1x8x32xf32> to vector<8x32xf32>
    %126 = vector.shape_cast %63 : vector<8x32xf32> to vector<1x8x32xf32>
    tpu.vector_store %arg17[%c0_60, %c0_61, %c0_62], %126 {strides = array<i32>} : memref<1x8x32xf32, #tpu.memory_space<vmem>>, vector<1x8x32xf32>,
    %c0_63 = arith.constant 0 : index
    %c0_64 = arith.constant 0 : index
    %c0_65 = arith.constant 0 : index
    %127 = vector.load %arg18[%c0_63, %c0_64, %c0_65] : memref<1x16x32xf32, #tpu.memory_space<vmem>>, vector<1x16x32xf32>
    %128 = vector.shape_cast %127 : vector<1x16x32xf32> to vector<16x32xf32>
    %129 = vector.shape_cast %123 : vector<16x32xf32> to vector<1x16x32xf32>
    tpu.vector_store %arg18[%c0_63, %c0_64, %c0_65], %129 {strides = array<i32>} : memref<1x16x32xf32, #tpu.memory_space<vmem>>, vector<1x16x32xf32>,
    return
  }
  func.func @transform_0(%arg0: i32) -> (i32, i32, i32) {
    %c0_i32 = arith.constant 0 : i32
    %c0_i32_0 = arith.constant 0 : i32
    %c0_i32_1 = arith.constant 0 : i32
    return %arg0, %c0_i32, %c0_i32_0 : i32, i32, i32
  }
  func.func @transform_1(%arg0: i32) -> (i32, i32, i32) {
    %c0_i32 = arith.constant 0 : i32
    %c0_i32_0 = arith.constant 0 : i32
    %c0_i32_1 = arith.constant 0 : i32
    return %arg0, %c0_i32, %c0_i32_0 : i32, i32, i32
  }
  func.func @transform_2(%arg0: i32) -> (i32, i32) {
    %c0_i32 = arith.constant 0 : i32
    %c0_i32_0 = arith.constant 0 : i32
    %c0_i32_1 = arith.constant 0 : i32
    return %c0_i32, %c0_i32_0 : i32, i32
  }
  func.func @transform_3(%arg0: i32) -> (i32, i32) {
    %c0_i32 = arith.constant 0 : i32
    %c0_i32_0 = arith.constant 0 : i32
    %c0_i32_1 = arith.constant 0 : i32
    return %c0_i32, %c0_i32_0 : i32, i32
  }
  func.func @transform_4(%arg0: i32) -> (i32, i32) {
    %c0_i32 = arith.constant 0 : i32
    %c0_i32_0 = arith.constant 0 : i32
    %c0_i32_1 = arith.constant 0 : i32
    return %c0_i32, %c0_i32_0 : i32, i32
  }
  func.func @transform_5(%arg0: i32) -> (i32, i32) {
    %c0_i32 = arith.constant 0 : i32
    %c0_i32_0 = arith.constant 0 : i32
    %c0_i32_1 = arith.constant 0 : i32
    return %c0_i32, %c0_i32_0 : i32, i32
  }
  func.func @transform_6(%arg0: i32) -> (i32, i32) {
    %c0_i32 = arith.constant 0 : i32
    %c0_i32_0 = arith.constant 0 : i32
    %c0_i32_1 = arith.constant 0 : i32
    return %c0_i32, %c0_i32_0 : i32, i32
  }
  func.func @transform_7(%arg0: i32) -> (i32, i32) {
    %c0_i32 = arith.constant 0 : i32
    %c0_i32_0 = arith.constant 0 : i32
    %c0_i32_1 = arith.constant 0 : i32
    return %c0_i32, %c0_i32_0 : i32, i32
  }
  func.func @transform_8(%arg0: i32) -> (i32, i32) {
    %c0_i32 = arith.constant 0 : i32
    %c0_i32_0 = arith.constant 0 : i32
    %c0_i32_1 = arith.constant 0 : i32
    return %c0_i32, %c0_i32_0 : i32, i32
  }
  func.func @transform_9(%arg0: i32) -> (i32, i32) {
    %c0_i32 = arith.constant 0 : i32
    %c0_i32_0 = arith.constant 0 : i32
    %c0_i32_1 = arith.constant 0 : i32
    return %c0_i32, %c0_i32_0 : i32, i32
  }
  func.func @transform_10(%arg0: i32) -> (i32, i32) {
    %c0_i32 = arith.constant 0 : i32
    %c0_i32_0 = arith.constant 0 : i32
    %c0_i32_1 = arith.constant 0 : i32
    return %c0_i32, %c0_i32_0 : i32, i32
  }
  func.func @transform_11(%arg0: i32) -> (i32, i32) {
    %c0_i32 = arith.constant 0 : i32
    %c0_i32_0 = arith.constant 0 : i32
    %c0_i32_1 = arith.constant 0 : i32
    return %c0_i32, %c0_i32_0 : i32, i32
  }
  func.func @transform_12(%arg0: i32) -> (i32, i32) {
    %c0_i32 = arith.constant 0 : i32
    %c0_i32_0 = arith.constant 0 : i32
    %c0_i32_1 = arith.constant 0 : i32
    return %c0_i32, %c0_i32_0 : i32, i32
  }
  func.func @transform_13(%arg0: i32) -> (i32, i32) {
    %c0_i32 = arith.constant 0 : i32
    %c0_i32_0 = arith.constant 0 : i32
    %c0_i32_1 = arith.constant 0 : i32
    return %c0_i32, %c0_i32_0 : i32, i32
  }
  func.func @transform_14(%arg0: i32) -> (i32, i32, i32) {
    %c0_i32 = arith.constant 0 : i32
    %c0_i32_0 = arith.constant 0 : i32
    %c0_i32_1 = arith.constant 0 : i32
    return %arg0, %c0_i32, %c0_i32_0 : i32, i32, i32
  }
  func.func @transform_15(%arg0: i32) -> (i32, i32, i32) {
    %c0_i32 = arith.constant 0 : i32
    %c0_i32_0 = arith.constant 0 : i32
    %c0_i32_1 = arith.constant 0 : i32
    return %arg0, %c0_i32, %c0_i32_0 : i32, i32, i32
  }
  func.func @transform_16(%arg0: i32) -> (i32, i32, i32) {
    %c0_i32 = arith.constant 0 : i32
    %c0_i32_0 = arith.constant 0 : i32
    %c0_i32_1 = arith.constant 0 : i32
    return %arg0, %c0_i32, %c0_i32_0 : i32, i32, i32
  }
  func.func @transform_17(%arg0: i32) -> (i32, i32, i32) {
    %c0_i32 = arith.constant 0 : i32
    %c0_i32_0 = arith.constant 0 : i32
    %c0_i32_1 = arith.constant 0 : i32
    return %arg0, %c0_i32, %c0_i32_0 : i32, i32, i32
  }
}

</mosaic_0001>

<bundles_post_ra>
// kernel: tpu_custom_call.1
= control target key start
LH: loop header
LB: loop body
LE: loop exit
PB: predicated region body
PF: predicated region fallthrough
CT: control target
= control target key end

     0   :  { %s1941_s0 = inlined_call_operand.vmem [shape: f32[2,8,48], index: 0, kind: input, shape index: {}]   ;;  %s1942_s1 = inlined_call_operand.vmem [shape: f32[2,16,32], index: 1, kind: input, shape index: {}]   ;;  %s1943_s2 = inlined_call_operand.vmem [shape: f32[48,32], index: 2, kind: input, shape index: {}]   ;;  %s1944_s3 = inlined_call_operand.vmem [shape: f32[1,32], index: 3, kind: input, shape index: {}]   ;;  %s1945_s4 = inlined_call_operand.vmem [shape: f32[32,32], index: 4, kind: input, shape index: {}]   ;;  %s1946_s5 = inlined_call_operand.vmem [shape: f32[1,32], index: 5, kind: input, shape index: {}]   ;;  %s1947_s6 = inlined_call_operand.vmem [shape: f32[32,32], index: 6, kind: input, shape index: {}]   ;;  %s1948_s7 = inlined_call_operand.vmem [shape: f32[1,32], index: 7, kind: input, shape index: {}]   ;;  %s1949_s8 = inlined_call_operand.vmem [shape: f32[32,32], index: 8, kind: input, shape index: {}]   ;;  %s1950_s9 = inlined_call_operand.vmem [shape: f32[1,32], index: 9, kind: input, shape index: {}]   ;;  %s1951_s10 = inlined_call_operand.vmem [shape: f32[48,32], index: 10, kind: input, shape index: {}]   ;;  %s1952_s11 = inlined_call_operand.vmem [shape: f32[1,32], index: 11, kind: input, shape index: {}]   ;;  %s1953_s12 = inlined_call_operand.vmem [shape: f32[48,32], index: 12, kind: input, shape index: {}]   ;;  %s1954_s13 = inlined_call_operand.vmem [shape: f32[1,32], index: 13, kind: input, shape index: {}]   ;;  %s1955_s14 = inlined_call_operand.vmem [shape: f32[2,1,16], index: 14, kind: input, shape index: {}]   ;;  %s1956_s15 = inlined_call_operand.vmem [shape: f32[2,1,8], index: 15, kind: input, shape index: {}]   ;;  %s1957_s16 = inlined_call_operand.hbm [shape: f32[2,8,32], index: 16, kind: output, shape index: {0}]   ;;  %s1958_s17 = inlined_call_operand.hbm [shape: f32[2,16,32], index: 17, kind: output, shape index: {1}]  }
   0x1   :  { %1968 = sst [smem:[#allocation15_spill]] %s1941_s0 }
   0x2   :  { %1969 = sst [smem:[#allocation16_spill]] %s1942_s1 }
   0x3   :  { %1970 = sst [smem:[#allocation17_spill]] %s1943_s2 }
   0x4   :  { %1971 = sst [smem:[#allocation18_spill]] %s1945_s4 }
   0x5   :  { %1972 = sst [smem:[#allocation19_spill]] %s1958_s17 }
   0x6   :  { %23 = vsyncpa [#allocation3], 0 }
   0x7   :  { %25 = vsyncpa [#allocation3 + $0x1], 0 }
   0x8   :  { %26 = vsyncpa [#allocation5], 0 }
   0x9   :  { %28 = vsyncpa [#allocation5 + $0x1], 0  ;;  %s1636_s24 = smov 0   ;;  %s1638_s25 = smov 0  }
   0xa   :  { %s1640_s26 = smov 0   ;;  %s1642_s27 = smov 0  }
   0xb LB: > { %1973 = sst [smem:[#allocation8_spill]] %s1528_s24  ;;  %s1657_s28 = sadd.s32 4294967295, %s1540_s27   ;;  %s1540_s27 = sphi %s1642_s27, %s1991_s27   ;;  %s1536_s26 = sphi %s1640_s26, %s1993_s26   ;;  %s1532_s25 = sphi %s1638_s25, %s1995_s25   ;;  %s1528_s24 = sphi %s1636_s24, %s1994_s24  }
   0xc   : > { %1974 = sst [smem:[#allocation9_spill]] %s1536_s26  ;;  %s1316_s29 = sadd.s32 4294967294, %s1540_s27  }
   0xd   : > { %1975 = sst [smem:[#allocation10_spill]] %s1540_s27  ;;  %s1661_s0 = sadd.s32 1, %s1540_s27  }
   0xe   : > { %1976 = sst [smem:[#allocation11_spill]] %s1661_s0  ;;  %s397_s30 = sadd.s32 1, %s1536_s26 }
   0xf   : > { %s394_s18 = ssub.s32 %s1540_s27, %s1661_s0  ;;  %p407_p0 = scmp.ne.s32.totalorder %s1536_s26, %s1532_s25 }
  0x10   : > { %p395_p1 = scmp.eq.s32.totalorder %s394_s18, 0  ;;  %p408_p2 = scmp.eq.s32.totalorder %s1657_s28, 1 }
  0x11   : > { %p413_p3 = scmp.ne.s32.totalorder %s1532_s25, %s1528_s24  ;;  %p414_p4 = scmp.eq.s32.totalorder %s1316_s29, 1 }
  0x12   : > { %s1672_s19 = scalar_select %p395_p1, %s1536_s26, %s397_s30  }
  0x13   : > { %p1674_p5 = por %p408_p2, %p407_p0  ;;  %p1678_p6 = por %p414_p4, %p413_p3 }
  0x14   : > { %1977 = sst [smem:[#allocation12_spill]] %s1672_s19  ;;  %p1319_p7 = scmp.ge.s32.totalorder %s1540_s27, 1 }
  0x15   : > { %s1978_s1 = scalar_select %p1674_p5, 1, 0 }
  0x16   : > { %s1980_s20 = scalar_select %p1678_p6, 1, 0 }
  0x17   : > { %1979 = sst [smem:[#allocation13_spill]] %s1978_s1  ;;  %p521_p8 = scmp.lt.s32.totalorder %s1540_s27, 3 }
  0x18   : > { %1981 = sst [smem:[#allocation14_spill]] %s1980_s20 }
  0x19   : > { %p522_p9 = pnand %p1319_p7, %p521_p8 }
  0x1a   : > { %s1982_s4 = sld [smem:[#allocation18_spill]] (!%p522_p9)  ;;  %p588_p10 = scmp.lt.s32.totalorder (!%p522_p9), %s1657_s28, 1 }
  0x1b   : > { %525 = sbr.rel (%p522_p9) target bundleno = 1199 (0x4af), region = 84  ;;  %s1983_s2 = sld [smem:[#allocation17_spill]] (!%p522_p9) }
  0x1c   : > { %s1984_s22 = sld [smem:[#allocation16_spill]] (!%p522_p9)  ;;  %s1542_s18 = smov (!%p522_p9), 112  }
  0x1d   : > { %s1985_s17 = sld [smem:[#allocation15_spill]] (!%p522_p9) }
  0x20   : > { %v644_v0 = vld [vmem:[%s1982_s4 + $0x18] sm:$0xff]  ;;  %v643_v1 = vld [vmem:[%s1982_s4 + $0x10] sm:$0xff]  ;;  %v642_v4 = vld [vmem:[%s1982_s4 + $0x8] sm:$0xff]  ;;  %s1704_s23 = scalar_select %p588_p10, %s1657_s28, 1  ;;  %vm649_vm0 = vcmask 261120   ;;  %vm617_vm1 = vcmask 392192  }
  0x21   : > { %668 = vmatpush.msra.mxu1 %v644_v0  ;;  %v612_v2 = vld [vmem:[%s1983_s2 + $0x28] sm:$0xff]  ;;  %v611_v3 = vld [vmem:[%s1983_s2 + $0x20] sm:$0xff]  ;;  %v610_v6 = vld [vmem:[%s1983_s2 + $0x18] sm:$0xff]  ;;  %vm713_vm2 = vcmask 130048   ;;  %vm989_vm3 = vcmask 64512  }
  0x22   : > { %v641_v5 = vld [vmem:[%s1982_s4] sm:$0xff]  ;;  %631 = vmatpush.msra.mxu0 %v612_v2  ;;  %v609_v7 = vld [vmem:[%s1983_s2 + $0x10] sm:$0xff]  ;;  %s1359_s0 = sshll.u32 %s1704_s23, 4  ;;  %s1322_s20 = sshll.u32 %s1704_s23, 3  ;;  %v608_v9 = vld [vmem:[%s1983_s2 + $0x8] sm:$0xff] }
  0x23   : > { %669 = vmatpush.msra.mxu1 %v643_v1  ;;  %s596_s4 = scalar_lea.vmem %s1984_s22, %s1359_s0  ;;  %s591_s26 = scalar_lea.vmem %s1985_s17, %s1322_s20  ;;  %v607_v10 = vld [vmem:[%s1983_s2] sm:$0xff]  ;;  %v682_v13 = vld [vmem:[%s1947_s6 + $0x18] sm:$0xff]  ;;  %v681_v14 = vld [vmem:[%s1947_s6 + $0x10] sm:$0xff] }
  0x24   : > { %632 = vmatpush.msra.mxu0 %v611_v3  ;;  %v604_v8 = vld [vmem:[%s596_s4] sm:$0xff]  ;;  %v605_v12 = vld [vmem:[%s596_s4 + $0x8] sm:$0xff]  ;;  %699 = vmatpush.msra.mxu2 %v682_v13  ;;  %v866_v17 = vld [vmem:[%s1949_s8 + $0x18] sm:$0xff]  ;;  %s599_s1 = scalar_lea.vmem %s1955_s14, %s1704_s23  ;;  %s602_s27 = scalar_lea.vmem %s1956_s15, %s1704_s23 }
  0x25   : > { %670 = vmatpush.msra.mxu1 %v642_v4  ;;  %v1727_v11 = vld [vmem:[%s591_s26] sm:$0xff]  ;;  %v680_v15 = vld [vmem:[%s1947_s6 + $0x8] sm:$0xff]  ;;  %v865_v18 = vld [vmem:[%s1949_s8 + $0x10] sm:$0xff]  ;;  %s1543_s23 = smov 16   ;;  %s1354_s20 = sshll.u32 %s1657_s28, 3 }
  0x26   : > { %633 = vmatpush.msra.mxu0 %v610_v6  ;;  %700 = vmatpush.msra.mxu2 %v681_v14  ;;  %v679_v16 = vld [vmem:[%s1947_s6] sm:$0xff]  ;;  %v864_v19 = vld [vmem:[%s1949_s8 + $0x8] sm:$0xff]  ;;  %v897_v46 = vld [vmem:[%s1951_s10 + $0x18] sm:$0xff]  ;;  %s1172_s29 = scalar_lea.hbm %s1957_s16, %s1354_s20  ;;  %s1466_s20 = scalar_lea.hbm %s1957_s16, 16 }
  0x27   : > { %671 = vmatpush.msra.mxu1 %v641_v5  ;;  %v1414_v20 = vld [vmem:[%s1946_s5] ss:$0 sm:$0xff]  ;;  %v899_v44 = vld [vmem:[%s1951_s10 + $0x28] sm:$0xff]  ;;  %v896_v47 = vld [vmem:[%s1951_s10 + $0x10] sm:$0xff]  ;;  %s1176_s24 = sshll.u32 %s1172_s29, 4  ;;  %s1177_s24 = int_to_ptr.hbm [resolvable:$true] %s1176_s24 }
  0x28   : > { %1326 = vmatmul.msk.f32.vlgmr.msra.gmra.mxu1 %vm649_vm0, %v604_v8  ;;  %634 = vmatpush.msra.mxu0 %v609_v7  ;;  %v863_v21 = vld [vmem:[%s1949_s8] sm:$0xff]  ;;  %v895_v48 = vld [vmem:[%s1951_s10 + $0x8] sm:$0xff]  ;;  %v927_v3 = vld [vmem:[%s1953_s12 + $0x18] sm:$0xff] }
  0x29   : > { %701 = vmatpush.msra.mxu2 %v680_v15  ;;  %v1415_v24 = vld [vmem:[%s1944_s3] ss:$0 sm:$0xff]  ;;  %v929_v1 = vld [vmem:[%s1953_s12 + $0x28] sm:$0xff]  ;;  %v926_v4 = vld [vmem:[%s1953_s12 + $0x10] sm:$0xff] }
  0x2a   : > { %635 = vmatpush.msra.mxu0 %v608_v9  ;;  %v1775_v30 = vld [vmem:[%s599_s1] ss:$0 sm:$0xff]  ;;  %v925_v5 = vld [vmem:[%s1953_s12 + $0x8] sm:$0xff] }
  0x2b   : > { %702 = vmatpush.msra.mxu2 %v679_v16  ;;  %v1417_v31 = vld [vmem:[%s1948_s7] ss:$0 sm:$0xff] }
  0x2c   : > { %636 = vmatpush.msra.mxu0 %v607_v10  ;;  %1328 = vmatmul.msk.f32.vlgmr.msra.gmra.mxu2 %vm649_vm0, %v604_v8  ;;  %v1418_v38 = vld [vmem:[%s1950_s9] ss:$0 sm:$0xff] }
  0x2d   : > { %1325 = vmatmul.msk.f32.vlgmr.msra.gmra.mxu0 %vm617_vm1, %v1727_v11  ;;  %883 = vmatpush.msrb.mxu2 %v866_v17  ;;  %v898_v45 = vld [vmem:[%s1951_s10 + $0x20] sm:$0xff] }
  0x2e   : > { %v894_v49 = vld [vmem:[%s1951_s10] sm:$0xff] }
  0x2f   : > { %884 = vmatpush.msrb.mxu2 %v865_v18  ;;  %v1419_v62 = vld [vmem:[%s1952_s11] ss:$0 sm:$0xff] }
  0x30   : > { %1327 = vmatmul.msk.f32.gmra.mxu1 %vm649_vm0, %v605_v12  ;;  %v928_v2 = vld [vmem:[%s1953_s12 + $0x20] sm:$0xff] }
  0x31   : > { %885 = vmatpush.msrb.mxu2 %v864_v19  ;;  %v924_v6 = vld [vmem:[%s1953_s12] sm:$0xff] }
  0x32   : > { %v1421_v19 = vld [vmem:[%s602_s27] ss:$0 sm:$0xff]  ;;  %s1460_s27 = sshra.s32 %s1177_s24, 4  ;;  %s1461_s27 = int_to_ptr.hbm [resolvable:$true] %s1460_s27 }
  0x33   : > { %886 = vmatpush.msrb.mxu2 %v863_v21  ;;  %s1462_s0 = scalar_lea.hbm %s1461_s27, 8  ;;  %p1467_p0 = scmp.lt.s32.totalorder %s1461_s27, %s1957_s16 }
  0x34   : > { %1329 = vmatmul.msk.f32.gmra.mxu2 %vm649_vm0, %v605_v12  ;;  %p1463_p11 = scmp.ne.s32.totalorder %s1461_s27, %s1462_s0  ;;  %p1468_p1 = scmp.lt.s32.totalorder %s1466_s20, %s1462_s0 }
  0x36   : > { %p1464_p12 = pnand %p1463_p11, %p1674_p5  ;;  %p1469_p2 = por %p1468_p1, %p1467_p0 }
  0x38   : > { %p1465_p13 = pneg %p1464_p12 }
  0x3a   : > { %p1470_p3 = pnand %p1469_p2, %p1465_p13 }
  0x3c   : > { %1338 = vmatmul.msk.f32.vlgmr.msrb.gmra.mxu2 %vm649_vm0, %v604_v8 }
  0x44   : > { %1339 = vmatmul.msk.f32.gmra.mxu2 %vm649_vm0, %v605_v12 }
  0xa5   : > { %v673_v22 = vpop.f32.mrf.mxu1 }
  0xa6   : > { %v674_v23 = vadd.f32 %v1414_v20, %v673_v22 }
  0xa8   : > { %782 = vrot.lane.b32.xlu1 %v674_v23, %s1542_s18 }
  0xaa   : > { %v638_v25 = vpop.f32.mrf.mxu0 }
  0xab   : > { %v639_v26 = vadd.f32 %v1415_v24, %v638_v25 }
  0xad   : > { %v676_v27 = vpop.f32.mrf.mxu1 }
  0xae   : > { %v677_v28 = vadd.f32 %v1414_v20, %v676_v27 }
  0xaf   : > { %v704_v29 = vpop.f32.mrf.mxu2 }
  0xb0   : > { %1330 = vmatpush.xpose.msk.msra.mxu3 %vm713_vm2, %v677_v28  ;;  %780 = vrot.lane.b32.xlu1 %v639_v26, %s1542_s18  ;;  %v705_v37 = vadd.f32 %v1417_v31, %v704_v29 }
  0xb4   : > { %1331 = vmatpush.xpose.msk.msra.mxu3 %vm713_vm2, %v674_v23 }
  0xb7   : > { %1332 = vmatmul.msk.f32.vlgmr.msra.gmra.mxu3 %vm713_vm2, %v639_v26  ;;  %v707_v33 = vpop.f32.mrf.mxu2 }
  0xb8   : > { %v708_v35 = vadd.f32 %v1417_v31, %v707_v33 }
  0xba   : > { %769 = vmatpush.msrb.mxu3 %v708_v35  ;;  %v1409_v43 = vpack.i.bf16 %v705_v37, %v708_v35 }
  0xbc   : > { %770 = vmatpush.msrb.mxu3 %v705_v37 }
  0xbe   : > { %914 = vmatpush.msra.mxu3 %v899_v44 }
  0xbf   : > { %v888_v39 = vpop.f32.mrf.mxu2 }
  0xc0   : > { %v1785_v40 = vadd.f32 %v1418_v38, %v888_v39  ;;  %915 = vmatpush.msra.mxu3 %v898_v45 }
  0xc2   : > { %1047 = vrot.lane.b32.xlu2 %v1785_v40, %s1542_s18  ;;  %916 = vmatpush.msra.mxu3 %v897_v46 }
  0xc4   : > { %917 = vmatpush.msra.mxu3 %v896_v47 }
  0xc6   : > { %918 = vmatpush.msra.mxu3 %v895_v48 }
  0xc7   : > { %v891_v41 = vpop.f32.mrf.mxu2 }
  0xc8   : > { %v1789_v42 = vadd.f32 %v1418_v38, %v891_v41  ;;  %919 = vmatpush.msra.mxu3 %v894_v49 }
  0xca   : > { %1049 = vrot.lane.b32.xlu1 %v1789_v42, %s1542_s18 }
  0xd2   : > { %1410 = vrot.lane.b32.xlu1 %v1409_v43, %s1542_s18 }
 0x11a   : > { %v783_v50 = vpop.permute.xlu1 %782 }
 0x11c   : > { %v1048_v10 = vpop.permute.xlu2 %1047 }
 0x122   : > { %v781_v54 = vpop.permute.xlu1 %780 }
 0x13a   : > { %v740_v32 = vpop.f32.mrf.mxu3 }
 0x13b   : > { %v741_v34 = vadd.f32 %v1775_v30, %v740_v32 }
 0x13c   : > { %v1050_v56 = vpop.permute.xlu1 %1049 }
 0x13d   : > { %v743_v36 = vsel %vm713_vm2, %v741_v34, -inf }
 0x13e   : > { %744 = vmax.xlane.f32.xlu0 %v743_v36 }
 0x144   : > { %v1411_v58 = vpop.permute.xlu1 %1410 }
 0x145   : > { %v1412_v59 = vunpack.i.l.bf16 %v1411_v58  ;;  %v1413_v60 = vunpack.i.h.bf16 %v1411_v58 }
 0x147   : > { %846 = vmatpush.msrb.mxu1 %v1412_v59 }
 0x149   : > { %847 = vmatpush.msrb.mxu1 %v1413_v60 }
 0x152   : > { %784 = vrot.lane.b32.xlu0 %v677_v28, %s1542_s18 }
 0x1b1   : > { %v745_v51 = vpop.xlane.xlu0 %744 }
 0x1b2   : > { %v746_v52 = vsub.f32 %v741_v34, %v745_v51 }
 0x1b4   : > { %v747_v53 = vmul.f32 1.442695, %v746_v52 }
 0x1b6   : > { %1422 = vpow2.f32 %v747_v53 }
 0x1bc   : > { %v1813_v55 = vpop.eup %1422 }
 0x1bd   : > { %1333 = vmatmul.msk.f32.vlgmr.msrb.gmra.mxu3 %vm713_vm2, %v1813_v55  ;;  %v749_v35 = vsel %vm713_vm2, %v1813_v55, 0.0 }
 0x1c4   : > { %v785_v57 = vpop.permute.xlu0 %784 }
 0x1c5   : > { %1334 = vmatpush.xpose.msk.msrb.mxu0 %vm713_vm2, %v785_v57  ;;  %1340 = vmatmul.msk.f32.vlgmr.msra.gmra.mxu3 %vm617_vm1, %v1727_v11 }
 0x1c9   : > { %1335 = vmatpush.xpose.msk.msrb.mxu0 %vm713_vm2, %v783_v50 }
 0x1cc   : > { %1336 = vmatmul.msk.f32.vlgmr.msrb.gmra.mxu0 %vm713_vm2, %v781_v54 }
 0x1cd   : > { %944 = vmatpush.msra.mxu0 %v929_v1 }
 0x1cf   : > { %945 = vmatpush.msra.mxu0 %v928_v2 }
 0x1d1   : > { %946 = vmatpush.msra.mxu0 %v927_v3 }
 0x1d3   : > { %947 = vmatpush.msra.mxu0 %v926_v4 }
 0x1d5   : > { %948 = vmatpush.msra.mxu0 %v925_v5 }
 0x1d7   : > { %949 = vmatpush.msra.mxu0 %v924_v6 }
 0x1d8   : > { %1341 = vmatmul.msk.f32.vlgmr.msra.gmra.mxu0 %vm617_vm1, %v1727_v11  ;;  %v1420_v11 = vld [vmem:[%s1954_s13] ss:$0 sm:$0xff] }
 0x240   : > { %v1822_v61 = vpop.f32.mrf.mxu3 }
 0x248   : > { %v921_v63 = vpop.f32.mrf.mxu3 }
 0x249   : > { %v922_v0 = vadd.f32 %v1419_v62, %v921_v63  ;;  %v809_v7 = vpop.f32.mrf.mxu0 }
 0x24a   : > { %v810_v8 = vadd.f32 %v1775_v30, %v809_v7 }
 0x24b   : > { %1051 = vrot.lane.b32.xlu2 %v922_v0, %s1542_s18  ;;  %1342 = vmatpush.xpose.msk.msra.mxu1 %vm713_vm2, %v922_v0 }
 0x24c   : > { %v812_v9 = vsel %vm713_vm2, %v810_v8, -inf }
 0x255   : > { %v951_v13 = vpop.f32.mrf.mxu0 }
 0x256   : > { %v952_v14 = vadd.f32 %v1420_v11, %v951_v13 }
 0x258   : > { %1029 = vmatpush.msrb.mxu3 %v952_v14 }
 0x274   : > { %813 = vmax.xlane.f32.xlu2 %v812_v9 }
 0x28c   : > { %1101 = vrot.lane.b32.xlu2 %v952_v14, %s1542_s18  ;;  %s1883_s18 = sand.u32 1, %s1532_s25  }
 0x28d   : > { %s1320_s4 = sshll.u32 %s1883_s18, 3  ;;  %s1157_s17 = scalar_lea.sflag [#allocation3], %s1883_s18 }
 0x28e   : > { %s580_s26 = scalar_lea.vmem [#allocation2], %s1320_s4 }
 0x28f   : > { %s1174_s19 = sshll.u32 %s580_s26, 4  ;;  %s1175_s19 = int_to_ptr.vmem [resolvable:$true] %s1174_s19 }
 0x2a5   : > { %v1052_v12 = vpop.permute.xlu2 %1051 }
 0x2a6   : > { %1347 = vmatpush.xpose.msk.msrb.mxu0 %vm713_vm2, %v1052_v12 }
 0x2a9   : > { %1348 = vmatmul.msk.f32.vlgmr.msrb.gmra.mxu0 %vm713_vm2, %v1048_v10 }
 0x2b1   : > { %1349 = vmatmul.msk.f32.gmra.mxu0 %vm713_vm2, %v1050_v56 }
 0x2e7   : > { %v814_v15 = vpop.xlane.xlu2 %813 }
 0x2e8   : > { %v815_v16 = vsub.f32 %v810_v8, %v814_v15 }
 0x2ea   : > { %v816_v17 = vmul.f32 1.442695, %v815_v16 }
 0x2ec   : > { %1424 = vpow2.f32 %v816_v17 }
 0x2ef   : > { %v1102_v26 = vpop.permute.xlu2 %1101 }
 0x2f0   : > { %1125 = vmatpush.msra.mxu2 %v1102_v26 }
 0x2f2   : > { %v1425_v18 = vpop.eup %1424 }
 0x2f3   : > { %1337 = vmatmul.msk.f32.vlgmr.msrb.gmra.mxu1 %vm713_vm2, %v1425_v18  ;;  %v818_v34 = vsel %vm713_vm2, %v1425_v18, 0.0 }
 0x2fb   : > { %1343 = vmatmul.msk.f32.vlgmr.msra.gmra.mxu1 %vm713_vm2, %v1785_v40 }
 0x303   : > { %1344 = vmatmul.msk.f32.gmra.mxu1 %vm713_vm2, %v1789_v42 }
 0x326   : > { %v1076_v20 = vpop.f32.mrf.mxu0 }
 0x327   : > { %v1077_v21 = vadd.f32 %v1421_v19, %v1076_v20 }
 0x329   : > { %v1082_v22 = vsel %vm989_vm3, %v1077_v21, -inf }
 0x32a   : > { %1083 = vmax.xlane.f32.xlu0 %v1082_v22 }
 0x32e   : > { %v1079_v23 = vpop.f32.mrf.mxu0 }
 0x32f   : > { %v1080_v24 = vadd.f32 %v1421_v19, %v1079_v23 }
 0x331   : > { %v1085_v25 = vsel %vm989_vm3, %v1080_v24, -inf }
 0x332   : > { %1086 = vmax.xlane.f32.xlu1 %v1085_v25 }
 0x370   : > { %v849_v27 = vpop.f32.mrf.mxu1 }
 0x378   : > { %v983_v28 = vpop.f32.mrf.mxu1 }
 0x379   : > { %v984_v29 = vadd.f32 %v1421_v19, %v983_v28 }
 0x37b   : > { %v990_v30 = vsel %vm989_vm3, %v984_v29, -inf }
 0x37c   : > { %991 = vmax.xlane.f32.xlu0 %v990_v30 }
 0x380   : > { %v986_v31 = vpop.f32.mrf.mxu1 }
 0x381   : > { %v987_v32 = vadd.f32 %v1421_v19, %v986_v31 }
 0x383   : > { %v993_v33 = vsel %vm989_vm3, %v987_v32, -inf }
 0x384   : > { %994 = vmax.xlane.f32.xlu1 %v993_v33  ;;  %819 = vadd.xlane.f32.xlu0 %v818_v34 }
 0x38c   : > { %750 = vadd.xlane.f32.xlu0 %v749_v35 }
 0x39d   : > { %v1084_v36 = vpop.xlane.xlu0 %1083 }
 0x39e   : > { %v1088_v37 = vsub.f32 %v1077_v21, %v1084_v36 }
 0x3a0   : > { %v1090_v38 = vmul.f32 1.442695, %v1088_v37 }
 0x3a2   : > { %1426 = vpow2.f32 %v1090_v38 }
 0x3a5   : > { %v1087_v39 = vpop.xlane.xlu1 %1086 }
 0x3a6   : > { %v1089_v40 = vsub.f32 %v1080_v24, %v1087_v39 }
 0x3a8   : > { %v1427_v41 = vpop.eup %1426  ;;  %v1092_v42 = vmul.f32 1.442695, %v1089_v40 }
 0x3a9   : > { %1350 = vmatmul.msk.f32.vlgmr.msra.gmra.mxu2 %vm989_vm3, %v1427_v41  ;;  %v1094_v43 = vsel %vm989_vm3, %v1427_v41, 0.0 }
 0x3aa   : > { %1428 = vpow2.f32 %v1092_v42  ;;  %1095 = vadd.xlane.f32.xlu2 %v1094_v43 }
 0x3b0   : > { %v1429_v44 = vpop.eup %1428 }
 0x3b1   : > { %1351 = vmatmul.msk.f32.gmra.mxu2 %vm989_vm3, %v1429_v44  ;;  %v1097_v45 = vsel %vm989_vm3, %v1429_v44, 0.0 }
 0x3b2   : > { %1098 = vadd.xlane.f32.xlu1 %v1097_v45 }
 0x3ef   : > { %v992_v46 = vpop.xlane.xlu0 %991 }
 0x3f0   : > { %v996_v47 = vsub.f32 %v984_v29, %v992_v46 }
 0x3f2   : > { %v998_v48 = vmul.f32 1.442695, %v996_v47 }
 0x3f4   : > { %1430 = vpow2.f32 %v998_v48 }
 0x3f7   : > { %v995_v49 = vpop.xlane.xlu1 %994  ;;  %v820_v53 = vpop.xlane.xlu0 %819 }
 0x3f8   : > { %v997_v50 = vsub.f32 %v987_v32, %v995_v49 }
 0x3fa   : > { %v1431_v51 = vpop.eup %1430  ;;  %v1000_v52 = vmul.f32 1.442695, %v997_v50 }
 0x3fb   : > { %1345 = vmatmul.msk.f32.vlgmr.msrb.gmra.mxu3 %vm989_vm3, %v1431_v51  ;;  %v1002_v54 = vsel %vm989_vm3, %v1431_v51, 0.0 }
 0x3fc   : > { %1432 = vpow2.f32 %v1000_v52  ;;  %1003 = vadd.xlane.f32.xlu1 %v1002_v54 }
 0x3fd   : > { %1434 = vrcp.f32 %v820_v53 }
 0x3ff   : > { %v751_v13 = vpop.xlane.xlu0 %750 }
 0x402   : > { %v1433_v55 = vpop.eup %1432 }
 0x403   : > { %1346 = vmatmul.msk.f32.gmra.mxu3 %vm989_vm3, %v1433_v55  ;;  %v1005_v56 = vsel %vm989_vm3, %v1433_v55, 0.0  ;;  %v1435_v57 = vpop.eup %1434 }
 0x404   : > { %1006 = vadd.xlane.f32.xlu0 %v1005_v56  ;;  %v853_v58 = vmul.f32 %v1435_v57, %v820_v53 }
 0x406   : > { %v854_v59 = vsub.f32 2.0, %v853_v58 }
 0x408   : > { %v855_v60 = vmul.f32 %v1435_v57, %v854_v59 }
 0x40a   : > { %v856_v62 = vmul.f32 %v855_v60, %v849_v27 }
 0x415   : > { %858 = vrot.lane.b32.xlu1 %v856_v62, %s1543_s23 }
 0x41d   : > { %v1096_v63 = vpop.xlane.xlu2 %1095 }
 0x41e   : > { %1436 = vrcp.f32 %v1096_v63 }
 0x424   : > { %v1437_v0 = vpop.eup %1436 }
 0x425   : > { %v1135_v1 = vmul.f32 %v1437_v0, %v1096_v63  ;;  %v1099_v2 = vpop.xlane.xlu1 %1098 }
 0x426   : > { %1438 = vrcp.f32 %v1099_v2 }
 0x427   : > { %v1137_v3 = vsub.f32 2.0, %v1135_v1  ;;  %1440 = vrcp.f32 %v751_v13 }
 0x429   : > { %v1139_v4 = vmul.f32 %v1437_v0, %v1137_v3 }
 0x42c   : > { %v1439_v5 = vpop.eup %1438  ;;  %v1127_v6 = vpop.f32.mrf.mxu2 }
 0x42d   : > { %v1136_v7 = vmul.f32 %v1439_v5, %v1099_v2  ;;  %v1141_v8 = vmul.f32 %v1139_v4, %v1127_v6  ;;  %v1441_v14 = vpop.eup %1440 }
 0x42e   : > { %v776_v15 = vmul.f32 %v1441_v14, %v751_v13 }
 0x42f   : > { %v1138_v9 = vsub.f32 2.0, %v1136_v7  ;;  %1145 = vrot.lane.b32.xlu0 %v1141_v8, %s1543_s23 }
 0x430   : > { %v777_v16 = vsub.f32 2.0, %v776_v15 }
 0x431   : > { %v1140_v10 = vmul.f32 %v1439_v5, %v1138_v9 }
 0x432   : > { %v778_v18 = vmul.f32 %v1441_v14, %v777_v16 }
 0x434   : > { %v1130_v12 = vpop.f32.mrf.mxu2  ;;  %v779_v19 = vmul.f32 %v778_v18, %v1822_v61 }
 0x435   : > { %v1142_v11 = vmul.f32 %v1140_v10, %v1130_v12 }
 0x437   : > { %1147 = vrot.lane.b32.xlu0 %v1142_v11, %s1543_s23 }
 0x46f   : > { %v1004_v17 = vpop.xlane.xlu1 %1003 }
 0x487   : > { %v859_v20 = vpop.permute.xlu1 %858 }
 0x488   : > { %v861_v21 = vsel %vm713_vm2, %v779_v19, %v859_v20 }
 0x489   : > { %1153 = vst.msk [vmem:[%s580_s26] sm:$0xff] %vm649_vm0, %v861_v21 }
 0x48a   : > { %1473 = shalt.err (!%p1470_p3)
}
 0x48b   : > { %1361 = dma.vmem_to_hbm [thread:$0]  (%p1674_p5), %s1175_s19, 128, %s1177_s24, %s1157_s17   ;;  %1442 = vrcp.f32 %v1004_v17  ;;  %v1007_v61 = vpop.xlane.xlu0 %1006  ;;  %v1031_v26 = vpop.f32.mrf.mxu3 }
 0x48c   : > { %1444 = vrcp.f32 %v1007_v61  ;;  %s1321_s22 = sshll.u32 %s1883_s18, 4  ;;  %s1360_s29 = sshll.u32 %s1657_s28, 4 }
 0x48d   : > { %s587_s26 = scalar_lea.vmem [#allocation4], %s1321_s22  ;;  %s1987_s17 = sld [smem:[#allocation19_spill]] }
 0x48e   : > { %s1188_s0 = sshll.u32 %s587_s26, 4  ;;  %s1162_s28 = scalar_lea.sflag [#allocation5], %s1883_s18  ;;  %s1189_s0 = int_to_ptr.vmem [resolvable:$true] %s1188_s0 }
 0x491   : > { %v1443_v22 = vpop.eup %1442 }
 0x492   : > { %v1039_v23 = vmul.f32 %v1443_v22, %v1004_v17  ;;  %v1445_v25 = vpop.eup %1444 }
 0x493   : > { %v1040_v27 = vmul.f32 %v1445_v25, %v1007_v61  ;;  %s1187_s27 = scalar_lea.hbm %s1987_s17, %s1360_s29  ;;  %v1034_v33 = vpop.f32.mrf.mxu3  ;;  %s1494_s22 = scalar_lea.hbm %s1987_s17, 32 }
 0x494   : > { %v1041_v24 = vsub.f32 2.0, %v1039_v23  ;;  %s1190_s1 = sshll.u32 %s1187_s27, 4  ;;  %s1191_s1 = int_to_ptr.hbm [resolvable:$true] %s1190_s1 }
 0x495   : > { %v1042_v31 = vsub.f32 2.0, %v1040_v27  ;;  %s1488_s23 = sshra.s32 %s1191_s1, 4  ;;  %s1489_s23 = int_to_ptr.hbm [resolvable:$true] %s1488_s23 }
 0x496   : > { %v1043_v28 = vmul.f32 %v1443_v22, %v1041_v24  ;;  %s1490_s20 = scalar_lea.hbm %s1489_s23, 16  ;;  %p1495_p9 = scmp.lt.s32.totalorder %s1489_s23, %s1987_s17 }
 0x497   : > { %v1044_v34 = vmul.f32 %v1445_v25, %v1042_v31  ;;  %p1491_p4 = scmp.ne.s32.totalorder %s1489_s23, %s1490_s20  ;;  %p1496_p10 = scmp.lt.s32.totalorder %s1494_s22, %s1490_s20 }
 0x498   : > { %v1045_v29 = vmul.f32 %v1043_v28, %v1031_v26 }
 0x499   : > { %v1046_v35 = vmul.f32 %v1044_v34, %v1034_v33  ;;  %p1492_p7 = pnand %p1491_p4, %p1674_p5  ;;  %p1497_p11 = por %p1496_p10, %p1495_p9 }
 0x49b   : > { %p1493_p8 = pneg %p1492_p7 }
 0x49d   : > { %p1498_p12 = pnand %p1497_p11, %p1493_p8 }
 0x4a1   : > { %v1146_v30 = vpop.permute.xlu0 %1145 }
 0x4a2   : > { %v1151_v32 = vsel %vm713_vm2, %v1045_v29, %v1146_v30 }
 0x4a3   : > { %1154 = vst.msk [vmem:[%s587_s26] sm:$0xff] %vm649_vm0, %v1151_v32 }
 0x4a9   : > { %v1148_v36 = vpop.permute.xlu0 %1147 }
 0x4aa   : > { %v1152_v37 = vsel %vm713_vm2, %v1046_v35, %v1148_v36 }
 0x4ab   : > { %1155 = vst.msk [vmem:[%s587_s26 + $0x8] sm:$0xff] %vm649_vm0, %v1152_v37 }
 0x4ac   : > { %1501 = shalt.err (!%p1498_p12)
}
 0x4ad   : > { %s1544_s18 = smov 128   ;;  %s1545_s26 = smov 8  }
 0x4ae   : > { %1362 = dma.vmem_to_hbm [thread:$0]  (%p1674_p5), %s1189_s0, 256, %s1191_s1, %s1162_s28, %s1544_s18, %s1544_s18, %s1545_s26  }
 0x4af PF: > { %s1988_s24 = sld [smem:[#allocation10_spill]] }
 0x4b0   : > { %s1989_s27 = sld [smem:[#allocation8_spill]] }
 0x4b5   : > { %p1372_p13 = scmp.ge.s32.totalorder %s1988_s24, 2 }
 0x4b6   : > { %s1205_s4 = sand.u32 1, %s1989_s27  }
 0x4b7   : > { %p1366_p0 = pnand %p1372_p13, %p1678_p6  ;;  %s1206_s21 = scalar_lea.sflag [#allocation3], %s1205_s4 }
 0x4b9   : > { %p1367_p1 = pneg %p1366_p0 }
 0x4bb   : > { %1519 = dma.done.wait (%p1367_p1), %s1206_s21, 128  }
 0x4bc   : > { %1521 = vsyncadd (%p1367_p1), %s1206_s21, 4294967168  ;;  %s1216_s23 = scalar_lea.sflag [#allocation5], %s1205_s4 }
 0x4bd   : > { %1523 = dma.done.wait (%p1367_p1), %s1216_s23, 256  }
 0x4be   : > { %1525 = vsyncadd (%p1367_p1), %s1216_s23, 4294967040  ;;  %s1991_s27 = sld [smem:[#allocation11_spill]]  ;;  %s1994_s24 = smov %s1532_s25 }
 0x4bf   : > { %s1992_s20 = sld [smem:[#allocation9_spill]] }
 0x4c0   : > { %s1993_s26 = sld [smem:[#allocation12_spill]] }
 0x4c4   : > { %p31_p5 = scmp.ge.s32.totalorder %s1991_s27, 4  }
 0x4c5   : > { %s1995_s25 = smov %s1992_s20 }
 0x4c6   :  { %33 = sbr.rel (!%p31_p5) target bundleno = 11 (0xb), region = 145 }
 0x4cb   :  { %1222 = vsyncpa [#allocation3], 1 }
 0x4cc   :  { %1224 = vsyncpa [#allocation3 + $0x1], 1 }
 0x4cd   :  { %1225 = vsyncpa [#allocation5], 1 }
 0x4ce   :  { %1227 = vsyncpa [#allocation5 + $0x1], 1 }

</bundles_post_ra>
